<compile_context>
chip_gen: v7x
topology: tpu7x:2x2x1
jax: 0.10.0
libtpu: 0.0.40
codegen_flags: <defaults>
</compile_context>

<pallas_src>
import functools

import jax
import jax.numpy as jnp
from jax.experimental import pallas as pl
from jax.experimental.pallas import tpu as pltpu

_LANE = 128


def _round_up(x, m):
    return ((x + m - 1) // m) * m


def _round_mxu_n(d):
    # Matmul N dims: v6e/v7x MXUs are 256 wide, so avoid odd multiples of 128.
    # Harmless (slightly conservative) on v5e's 128-wide MXU.
    return _round_up(d, 256) if d > _LANE else _LANE


def _pad_to(a, shape):
    pads = [(0, s - d) for d, s in zip(a.shape, shape)]
    if all(p == (0, 0) for p in pads):
        return a
    return jnp.pad(a, pads)


def _vmem_capacity_bytes():
    try:
        return int(pltpu.get_tpu_info().vmem_capacity_bytes)
    except Exception:
        return 64 * 1024 * 1024  # conservative: v7x per-TC VMEM


def _single_buffered_spec(shape, index_map):
    """BlockSpec for an operand whose block index never changes.

    Buffered(1) disables double-buffering (halves its VMEM footprint).  Falls
    back to a default BlockSpec if this JAX version does not accept the kwarg.
    """
    try:
        return pl.BlockSpec(shape, index_map, pipeline_mode=pl.Buffered(1))
    except (TypeError, AttributeError):
        return pl.BlockSpec(shape, index_map)


# --------------------------------------------------------------------------
# Kernels
# --------------------------------------------------------------------------
def _mlp_kernel_resident(x_ref, w1_ref, b1_ref, w2_ref, b2_ref, o_ref):
    # x: (TB, D_in_p)  w1: (D_in_p, H_p)  b1: (1, H_p) f32
    # w2: (H_p, D_out_p)  b2: (1, D_out_p) f32  o: (TB, D_out_p)
    x = x_ref[...]
    h = jnp.dot(x, w1_ref[...], preferred_element_type=jnp.float32)
    h = jnp.maximum(h + b1_ref[...], 0.0)          # bias + ReLU in f32 on VPU
    h = h.astype(w2_ref.dtype)                     # back to MXU input dtype
    y = jnp.dot(h, w2_ref[...], preferred_element_type=jnp.float32)
    o_ref[...] = (y + b2_ref[...]).astype(o_ref.dtype)


def _mlp_kernel_htiled(x_ref, w1_ref, b1_ref, w2_ref, b2_ref, o_ref, acc_ref):
    # Hidden dim streamed in chunks of TH (grid axis 1, "arbitrary").
    # x: (TB, D_in_p)  w1: (D_in_p, TH)  b1: (1, TH)
    # w2: (TH, D_out_p)  b2: (1, D_out_p)  o: (TB, D_out_p)  acc: f32 scratch
    j = pl.program_id(1)

    @pl.when(j == 0)
    def _():
        acc_ref[...] = jnp.zeros_like(acc_ref)

    x = x_ref[...]
    h = jnp.dot(x, w1_ref[...], preferred_element_type=jnp.float32)
    h = jnp.maximum(h + b1_ref[...], 0.0)          # ReLU is elementwise over H -> exact per chunk
    h = h.astype(w2_ref.dtype)
    acc_ref[...] += jnp.dot(h, w2_ref[...], preferred_element_type=jnp.float32)

    @pl.when(j == pl.num_programs(1) - 1)
    def _():
        o_ref[...] = (acc_ref[...] + b2_ref[...]).astype(o_ref.dtype)


# --------------------------------------------------------------------------
# Parameter preparation (hoisted out of the per-call path)
# --------------------------------------------------------------------------
def prepare_params(w1, b1, w2, b2, *, compute_dtype=jnp.bfloat16):
    """Pad feature dims to MXU-friendly widths and cast ONCE.

    Zero padding is exact: padded K rows/columns contribute 0 through both
    dots and the ReLU; padded output columns are sliced off by the forward.
    """
    d_in, hidden = w1.shape
    d_out = w2.shape[1]
    d_in_p = _round_up(d_in, _LANE)
    h_p = _round_mxu_n(hidden)
    d_out_p = _round_mxu_n(d_out)

    c_dtype = jnp.dtype(compute_dtype)
    w1p = _pad_to(jnp.asarray(w1), (d_in_p, h_p)).astype(c_dtype)
    w2p = _pad_to(jnp.asarray(w2), (h_p, d_out_p)).astype(c_dtype)
    b1p = _pad_to(jnp.asarray(b1).reshape(1, -1), (1, h_p)).astype(jnp.float32)
    b2p = _pad_to(jnp.asarray(b2).reshape(1, -1), (1, d_out_p)).astype(jnp.float32)
    return {
        "w1": w1p, "b1": b1p, "w2": w2p, "b2": b2p,
        "d_in": int(d_in), "d_out": int(d_out),
        "compute_dtype": c_dtype,
    }


# --------------------------------------------------------------------------
# Forward
# --------------------------------------------------------------------------
@functools.partial(
    jax.jit,
    static_argnames=("d_in", "d_out", "compute_dtype", "block_b", "out_dtype",
                     "force_h_tiled"),
)
def _mlp_forward_impl(x, w1p, b1p, w2p, b2p, *, d_in, d_out, compute_dtype,
                      block_b, out_dtype, force_h_tiled):
    B = x.shape[0]
    d_in_p, h_p = w1p.shape
    d_out_p = w2p.shape[1]
    c_dtype = jnp.dtype(compute_dtype)
    c_bytes = c_dtype.itemsize
    o_bytes = jnp.dtype(out_dtype).itemsize

    # ---- per-call x prep: pad only the feature (K) dim; never the batch ----
    xp = x
    if d_in_p != d_in:
        xp = jnp.pad(xp, ((0, 0), (0, d_in_p - d_in)))
    xp = xp.astype(c_dtype)

    # ---- batch tile: sublane aligned, >=2 grid tiles when batch allows
    #      (keeps both v7x TensorCores busy under "parallel") ----
    sub = 16 if c_dtype == jnp.dtype(jnp.bfloat16) else 8
    tb0 = _round_up(min(block_b, B), sub)
    if B >= 2 * sub:
        tb0 = min(tb0, _round_up(pl.cdiv(B, 2), sub))
    tb0 = max(sub, tb0)
    if tb0 >= B:
        tb0 = B                      # full-dim block: always legal, no ragged tile

    # ---- generation-aware VMEM budgeting ----
    vmem_cap = _vmem_capacity_bytes()
    tile_budget = vmem_cap // 2      # leave room for compiler scratch / retiling

    def resident_ws(tb_):
        return (
            (d_in_p * h_p + h_p * d_out_p) * c_bytes   # weights (single-buffered)
            + (h_p + d_out_p) * 4                      # biases (single-buffered)
            + 2 * tb_ * d_in_p * c_bytes               # x tile (double-buffered)
            + 2 * tb_ * d_out_p * o_bytes              # o tile (double-buffered)
            + tb_ * h_p * (4 + c_bytes)                # f32 hidden + cast
        )

    def htiled_ws(tb_, th_):
        return (
            2 * d_in_p * th_ * c_bytes                 # w1 chunk (double-buffered)
            + 2 * th_ * d_out_p * c_bytes              # w2 chunk (double-buffered)
            + 2 * th_ * 4 + d_out_p * 4                # bias chunks
            + 2 * tb_ * d_in_p * c_bytes               # x tile
            + 2 * tb_ * d_out_p * o_bytes              # o tile
            + tb_ * d_out_p * 4                        # f32 accumulator scratch
            + tb_ * th_ * (4 + c_bytes)                # f32 hidden chunk + cast
        )

    # Resident-weights fast path: shrink TB first if close to budget.
    tb = tb0
    while resident_ws(tb) > tile_budget and tb > sub:
        tb = max(sub, _round_up((tb + 1) // 2, sub))
    use_resident = (resident_ws(tb) <= tile_budget) and not force_h_tiled

    th = h_p
    if not use_resident:
        # Hidden-dim-streamed fallback (weights cannot stay resident, e.g.
        # transformer-sized MLPs on v7x's 64 MiB VMEM).
        tb = tb0
        m = h_p // _LANE
        cands = sorted({_LANE * d for d in range(1, m + 1) if m % d == 0},
                       reverse=True)
        th = cands[-1]
        for cand in cands:
            if htiled_ws(tb, cand) <= tile_budget:
                th = cand
                break
        while htiled_ws(tb, th) > tile_budget and tb > sub:
            tb = max(sub, _round_up((tb + 1) // 2, sub))
        if tb > B:
            tb = B

    grid_b = pl.cdiv(B, tb)

    ws = resident_ws(tb) if use_resident else htiled_ws(tb, th)
    vmem_limit = int(min(0.9 * vmem_cap, max(2 * ws, 32 * 1024 * 1024)))

    flops = 2 * B * (d_in_p * h_p + h_p * d_out_p)
    weight_bytes = (d_in_p * h_p + h_p * d_out_p) * c_bytes
    bytes_accessed = (
        B * d_in_p * c_bytes
        + weight_bytes * (1 if use_resident else grid_b)
        + (h_p + d_out_p) * 4
        + B * d_out_p * o_bytes
    )
    cost = pl.CostEstimate(flops=flops, transcendentals=0,
                           bytes_accessed=bytes_accessed)

    if use_resident:
        out = pl.pallas_call(
            _mlp_kernel_resident,
            out_shape=jax.ShapeDtypeStruct((B, d_out_p), out_dtype),
            grid=(grid_b,),
            in_specs=[
                pl.BlockSpec((tb, d_in_p), lambda i: (i, 0)),          # x: streamed
                _single_buffered_spec((d_in_p, h_p), lambda i: (0, 0)),  # w1: resident
                _single_buffered_spec((1, h_p), lambda i: (0, 0)),       # b1: resident
                _single_buffered_spec((h_p, d_out_p), lambda i: (0, 0)), # w2: resident
                _single_buffered_spec((1, d_out_p), lambda i: (0, 0)),   # b2: resident
            ],
            out_specs=pl.BlockSpec((tb, d_out_p), lambda i: (i, 0)),
            compiler_params=pltpu.CompilerParams(
                dimension_semantics=("parallel",),
                vmem_limit_bytes=vmem_limit,
            ),
            cost_estimate=cost,
        )(xp, w1p, b1p, w2p, b2p)
    else:
        out = pl.pallas_call(
            _mlp_kernel_htiled,
            out_shape=jax.ShapeDtypeStruct((B, d_out_p), out_dtype),
            grid=(grid_b, h_p // th),
            in_specs=[
                pl.BlockSpec((tb, d_in_p), lambda i, j: (i, 0)),       # x: per batch tile
                pl.BlockSpec((d_in_p, th), lambda i, j: (0, j)),       # w1: H-chunked
                pl.BlockSpec((1, th), lambda i, j: (0, j)),            # b1: H-chunked
                pl.BlockSpec((th, d_out_p), lambda i, j: (j, 0)),      # w2: H-chunked
                _single_buffered_spec((1, d_out_p), lambda i, j: (0, 0)),  # b2: resident
            ],
            out_specs=pl.BlockSpec((tb, d_out_p), lambda i, j: (i, 0)),
            scratch_shapes=[pltpu.VMEM((tb, d_out_p), jnp.float32)],
            compiler_params=pltpu.CompilerParams(
                dimension_semantics=("parallel", "arbitrary"),
                vmem_limit_bytes=vmem_limit,
            ),
            cost_estimate=cost,
        )(xp, w1p, b1p, w2p, b2p)

    if d_out_p != d_out:
        out = out[:, :d_out]
    return out


def mlp_forward(x, params, *, block_b=1024, out_dtype=None, force_h_tiled=False):
    """y = relu(x @ w1 + b1) @ w2 + b2 with pre-prepared (padded/cast) params."""
    out_dtype = x.dtype if out_dtype is None else out_dtype
    return _mlp_forward_impl(
        x, params["w1"], params["b1"], params["w2"], params["b2"],
        d_in=params["d_in"], d_out=params["d_out"],
        compute_dtype=params["compute_dtype"],
        block_b=int(block_b), out_dtype=jnp.dtype(out_dtype),
        force_h_tiled=bool(force_h_tiled),
    )


def init_params(key, input_dim, hidden_dim, output_dim):
    """Deterministic init mimicking nn.Linear's uniform(-1/sqrt(in), 1/sqrt(in))."""
    k1, k2, k3, k4 = jax.random.split(key, 4)
    bound1 = 1.0 / jnp.sqrt(input_dim)
    bound2 = 1.0 / jnp.sqrt(hidden_dim)
    w1 = jax.random.uniform(k1, (input_dim, hidden_dim), jnp.float32, -bound1, bound1)
    b1 = jax.random.uniform(k2, (1, hidden_dim), jnp.float32, -bound1, bound1)
    w2 = jax.random.uniform(k3, (hidden_dim, output_dim), jnp.float32, -bound2, bound2)
    b2 = jax.random.uniform(k4, (1, output_dim), jnp.float32, -bound2, bound2)
    return w1, b1, w2, b2


if __name__ == "__main__":
    key = jax.random.PRNGKey(0)
    kx, kp = jax.random.split(key)

    batch, input_dim, hidden_dim, output_dim = 8, 32, 64, 16

    x = jax.random.normal(kx, (batch, input_dim), jnp.float32)
    w1, b1, w2, b2 = init_params(kp, input_dim, hidden_dim, output_dim)

    # Reference (same math as the PyTorch forward), in f32.
    ref = jnp.maximum(x @ w1 + b1, 0.0) @ w2 + b2

    # Exact path: f32 MXU inputs, resident-weights kernel.
    p_f32 = prepare_params(w1, b1, w2, b2, compute_dtype=jnp.float32)
    out_f32 = mlp_forward(x, p_f32)
    jax.block_until_ready(out_f32)
    assert out_f32.shape == (batch, output_dim)
    assert jnp.allclose(out_f32, ref, atol=1e-5, rtol=1e-5)

    # Exact path through the hidden-dim-streamed fallback kernel.
    out_ht = mlp_forward(x, p_f32, force_h_tiled=True)
    jax.block_until_ready(out_ht)
    assert out_ht.shape == (batch, output_dim)
    assert jnp.allclose(out_ht, ref, atol=1e-5, rtol=1e-5)

    # Fast path: bf16 MXU inputs with f32 accumulation (looser tolerance).
    p_bf16 = prepare_params(w1, b1, w2, b2)  # compute_dtype=bf16 default
    out_bf16 = mlp_forward(x, p_bf16)
    jax.block_until_ready(out_bf16)
    assert out_bf16.shape == (batch, output_dim)
    assert jnp.allclose(out_bf16, ref, atol=5e-2, rtol=5e-2)

    print("KERNEL_OK")
</pallas_src>

<mosaic_0001>
module attributes {stable_mosaic.version = 11 : i64} {
  func.func @_mlp_kernel_resident(%arg0: i32, %arg1: memref<8x128xf32, #tpu.memory_space<vmem>>, %arg2: memref<128x128xf32, #tpu.memory_space<vmem>>, %arg3: memref<1x128xf32, #tpu.memory_space<vmem>>, %arg4: memref<128x128xf32, #tpu.memory_space<vmem>>, %arg5: memref<1x128xf32, #tpu.memory_space<vmem>>, %arg6: memref<8x128xf32, #tpu.memory_space<vmem>>) attributes {dimension_semantics = [#tpu.dimension_semantics<parallel>], iteration_bounds = array<i64: 1>, scalar_prefetch = 0 : i64, scratch_operands = 0 : i64, tpu.core_type = #tpu.core_type<tc>, window_params = [{transform_indices = @transform_0, window_bounds = array<i64: 8, 128>}, {pipeline_mode = #tpu.pipeline_mode<synchronous>, transform_indices = @transform_1, window_bounds = array<i64: 128, 128>}, {pipeline_mode = #tpu.pipeline_mode<synchronous>, transform_indices = @transform_2, window_bounds = array<i64: 1, 128>}, {pipeline_mode = #tpu.pipeline_mode<synchronous>, transform_indices = @transform_3, window_bounds = array<i64: 128, 128>}, {pipeline_mode = #tpu.pipeline_mode<synchronous>, transform_indices = @transform_4, window_bounds = array<i64: 1, 128>}, {transform_indices = @transform_5, window_bounds = array<i64: 8, 128>}]} {
    %c0 = arith.constant 0 : index
    %c0_0 = arith.constant 0 : index
    %0 = vector.load %arg1[%c0, %c0_0] : memref<8x128xf32, #tpu.memory_space<vmem>>, vector<8x128xf32>
    %c0_1 = arith.constant 0 : index
    %c0_2 = arith.constant 0 : index
    %1 = vector.load %arg2[%c0_1, %c0_2] : memref<128x128xf32, #tpu.memory_space<vmem>>, vector<128x128xf32>
    %cst = arith.constant dense<0.000000e+00> : vector<8x128xf32>
    %2 = tpu.matmul %0, %1, %cst {dimension_numbers = #tpu.dot_dimension_numbers<[1], [0], [0], [1], [0, 0, 1, 1], [], []>} : vector<8x128xf32>, vector<128x128xf32>, vector<8x128xf32> -> vector<8x128xf32>
    %c0_3 = arith.constant 0 : index
    %c0_4 = arith.constant 0 : index
    %3 = vector.load %arg3[%c0_3, %c0_4] : memref<1x128xf32, #tpu.memory_space<vmem>>, vector<1x128xf32>
    %4 = vector.broadcast %3 : vector<1x128xf32> to vector<8x128xf32>
    %5 = arith.addf %2, %4 : vector<8x128xf32>
    %cst_5 = arith.constant 0.000000e+00 : f32
    %6 = vector.broadcast %cst_5 : f32 to vector<8x128xf32>
    %7 = arith.maximumf %5, %6 : vector<8x128xf32>
    %c0_6 = arith.constant 0 : index
    %c0_7 = arith.constant 0 : index
    %8 = vector.load %arg4[%c0_6, %c0_7] : memref<128x128xf32, #tpu.memory_space<vmem>>, vector<128x128xf32>
    %cst_8 = arith.constant dense<0.000000e+00> : vector<8x128xf32>
    %9 = tpu.matmul %7, %8, %cst_8 {dimension_numbers = #tpu.dot_dimension_numbers<[1], [0], [0], [1], [0, 0, 1, 1], [], []>} : vector<8x128xf32>, vector<128x128xf32>, vector<8x128xf32> -> vector<8x128xf32>
    %c0_9 = arith.constant 0 : index
    %c0_10 = arith.constant 0 : index
    %10 = vector.load %arg5[%c0_9, %c0_10] : memref<1x128xf32, #tpu.memory_space<vmem>>, vector<1x128xf32>
    %11 = vector.broadcast %10 : vector<1x128xf32> to vector<8x128xf32>
    %12 = arith.addf %9, %11 : vector<8x128xf32>
    %c0_11 = arith.constant 0 : index
    %c0_12 = arith.constant 0 : index
    %13 = vector.load %arg6[%c0_11, %c0_12] : memref<8x128xf32, #tpu.memory_space<vmem>>, vector<8x128xf32>
    tpu.vector_store %arg6[%c0_11, %c0_12], %12 {strides = array<i32>} : memref<8x128xf32, #tpu.memory_space<vmem>>, vector<8x128xf32>,
    return
  }
  func.func @transform_0(%arg0: i32) -> (i32, i32) {
    %c0_i32 = arith.constant 0 : i32
    %c0_i32_0 = arith.constant 0 : i32
    return %arg0, %c0_i32 : i32, i32
  }
  func.func @transform_1(%arg0: i32) -> (i32, i32) {
    %c0_i32 = arith.constant 0 : i32
    %c0_i32_0 = arith.constant 0 : i32
    %c0_i32_1 = arith.constant 0 : i32
    return %c0_i32, %c0_i32_0 : i32, i32
  }
  func.func @transform_2(%arg0: i32) -> (i32, i32) {
    %c0_i32 = arith.constant 0 : i32
    %c0_i32_0 = arith.constant 0 : i32
    %c0_i32_1 = arith.constant 0 : i32
    return %c0_i32, %c0_i32_0 : i32, i32
  }
  func.func @transform_3(%arg0: i32) -> (i32, i32) {
    %c0_i32 = arith.constant 0 : i32
    %c0_i32_0 = arith.constant 0 : i32
    %c0_i32_1 = arith.constant 0 : i32
    return %c0_i32, %c0_i32_0 : i32, i32
  }
  func.func @transform_4(%arg0: i32) -> (i32, i32) {
    %c0_i32 = arith.constant 0 : i32
    %c0_i32_0 = arith.constant 0 : i32
    %c0_i32_1 = arith.constant 0 : i32
    return %c0_i32, %c0_i32_0 : i32, i32
  }
  func.func @transform_5(%arg0: i32) -> (i32, i32) {
    %c0_i32 = arith.constant 0 : i32
    %c0_i32_0 = arith.constant 0 : i32
    return %arg0, %c0_i32 : i32, i32
  }
}

</mosaic_0001>

<bundles_post_ra>
// kernel: _mlp_forward_impl.1
= control target key start
LH: loop header
LB: loop body
LE: loop exit
PB: predicated region body
PF: predicated region fallthrough
CT: control target
= control target key end

     0   :  { %10 = vsyncpa [#allocation3], 0  ;;  %s587_s0 = inlined_call_operand.vmem [shape: f32[8,128], index: 0, kind: input, shape index: {}]   ;;  %s588_s1 = inlined_call_operand.hbm [shape: f32[128,128], index: 1, kind: input, shape index: {}]   ;;  %s589_s2 = inlined_call_operand.vmem [shape: f32[1,128], index: 2, kind: input, shape index: {}]   ;;  %s590_s3 = inlined_call_operand.hbm [shape: f32[128,128], index: 3, kind: input, shape index: {}]   ;;  %s591_s4 = inlined_call_operand.vmem [shape: f32[1,128], index: 4, kind: input, shape index: {}]   ;;  %s592_s5 = inlined_call_operand.hbm [shape: f32[8,128], index: 5, kind: output, shape index: {}]  }
   0x1   :  { %11 = vsyncpa [#allocation6], 0 }
   0x2   :  { %12 = vsyncpa [#allocation4], 0  ;;  %s488_s18 = smov [#allocation2]   ;;  %s416_s22 = scalar_lea.hbm %s588_s1, 2048 }
   0x3   :  { %s20_s19 = sshll.u32 %s488_s18, 4  ;;  %p417_p0 = scmp.ne.s32.totalorder %s588_s1, %s416_s22  ;;  %s21_s19 = int_to_ptr.vmem [resolvable:$true] %s20_s19 }
   0x4   :  { %p420_p1 = scmp.lt.u32.totalorder %s416_s22, %s588_s1 }
   0x6   :  { %p422_p2 = pnand %p420_p1, %p417_p0 }
   0x8   :  { %425 = shalt.err (!%p422_p2)
}
   0x9   :  { %s426_s27 = scalar_lea.vmem %s21_s19, 2048  ;;  %p431_p4 = scmp.lt.s32.totalorder %s21_s19, %s21_s19 }
   0xa   :  { %p427_p3 = scmp.ne.s32.totalorder %s21_s19, %s426_s27  ;;  %p432_p5 = scmp.lt.s32.totalorder %s426_s27, %s426_s27 }
   0xc   :  { %p433_p6 = por %p432_p5, %p431_p4 }
   0xe   :  { %p434_p7 = pnand %p433_p6, %p427_p3 }
  0x10   :  { %437 = shalt.err (!%p434_p7)
}
  0x11   :  { %s489_s28 = smov 128   ;;  %s490_s29 = smov 8  }
  0x12   :  { %26 = dma.hbm_to_vmem [thread:$0]  %s588_s1, 2048, %s21_s19, [#allocation3], %s489_s28, %s489_s28, %s490_s29  }
  0x13   :  { %s491_s7 = smov [#allocation5]   ;;  %s438_s11 = scalar_lea.hbm %s590_s3, 2048 }
  0x14   :  { %s34_s8 = sshll.u32 %s491_s7, 4  ;;  %p439_p8 = scmp.ne.s32.totalorder %s590_s3, %s438_s11  ;;  %s35_s8 = int_to_ptr.vmem [resolvable:$true] %s34_s8 }
  0x15   :  { %p442_p9 = scmp.lt.u32.totalorder %s438_s11, %s590_s3 }
  0x17   :  { %p444_p10 = pnand %p442_p9, %p439_p8 }
  0x19   :  { %447 = shalt.err (!%p444_p10)
}
  0x1a   :  { %s448_s16 = scalar_lea.vmem %s35_s8, 2048  ;;  %p453_p12 = scmp.lt.s32.totalorder %s35_s8, %s35_s8 }
  0x1b   :  { %p449_p11 = scmp.ne.s32.totalorder %s35_s8, %s448_s16  ;;  %p454_p13 = scmp.lt.s32.totalorder %s448_s16, %s448_s16 }
  0x1d   :  { %p455_p0 = por %p454_p13, %p453_p12 }
  0x1f   :  { %p456_p1 = pnand %p455_p0, %p449_p11 }
  0x21   :  { %459 = shalt.err (!%p456_p1)
}
  0x22   :  { %40 = dma.hbm_to_vmem [thread:$0]  %s590_s3, 2048, %s35_s8, [#allocation6], %s489_s28, %s489_s28, %s490_s29  }
  0x23   :  { %482 = dma.done.wait [#allocation3], 2048  }
  0x24   :  { %483 = vsyncadd [#allocation3], 4294965248 }
  0x25   :  { %484 = dma.done.wait [#allocation6], 2048  }
  0x26   :  { %485 = vsyncadd [#allocation6], 4294965248  ;;  %v492_v0 = vmov 0.0|0.0   ;;  %vm493_vm0 = vmmov 0   ;;  %v494_v1 = vmov 0.0   ;;  %v50_v2 = vld [vmem:[#allocation2] sm:$0xff] }
  0x27   :  { %360 = vmatprep.subr.bf16.mxu0 %v492_v0  ;;  %322 = vmatprep.mubr.msk.f32.mxu0 %vm493_vm0, %v494_v1  ;;  %v51_v3 = vld [vmem:[#allocation2 + $0x8] sm:$0xff]  ;;  %v52_v4 = vld [vmem:[#allocation2 + $0x10] sm:$0xff]  ;;  %v53_v6 = vld [vmem:[#allocation2 + $0x18] sm:$0xff] }
  0x28   :  { %384 = vmatprep.subr.bf16.mxu1 %v492_v0  ;;  %357 = vmatprep.mubr.msk.f32.mxu1 %vm493_vm0, %v494_v1  ;;  %v361_v5 = vpack.c.bf16 %v51_v3, %v50_v2  ;;  %v364_v7 = vpack.c.bf16 %v53_v6, %v52_v4  ;;  %v54_v8 = vld [vmem:[#allocation2 + $0x20] sm:$0xff]  ;;  %v55_v9 = vld [vmem:[#allocation2 + $0x28] sm:$0xff]  ;;  %v146_v12 = vld [vmem:[#allocation5 + $0x10] sm:$0xff] }
  0x29   :  { %v144_v10 = vld [vmem:[#allocation5] sm:$0xff]  ;;  %v145_v11 = vld [vmem:[#allocation5 + $0x8] sm:$0xff]  ;;  %v147_v13 = vld [vmem:[#allocation5 + $0x18] sm:$0xff]  ;;  %v367_v14 = vpack.c.bf16 %v55_v9, %v54_v8 }
  0x2a   :  { %362 = vmatpush3.bf16.msra.mxu0 %v361_v5  ;;  %v385_v15 = vpack.c.bf16 %v145_v11, %v144_v10  ;;  %v56_v16 = vld [vmem:[#allocation2 + $0x30] sm:$0xff]  ;;  %v57_v17 = vld [vmem:[#allocation2 + $0x38] sm:$0xff]  ;;  %v388_v18 = vpack.c.bf16 %v147_v13, %v146_v12  ;;  %v148_v19 = vld [vmem:[#allocation5 + $0x20] sm:$0xff] }
  0x2b   :  { %363 = vmatprep.subr.bf16.mxu0 %v492_v0  ;;  %v149_v20 = vld [vmem:[#allocation5 + $0x28] sm:$0xff]  ;;  %v370_v21 = vpack.c.bf16 %v57_v17, %v56_v16  ;;  %v58_v22 = vld [vmem:[#allocation2 + $0x40] sm:$0xff]  ;;  %v150_v25 = vld [vmem:[#allocation5 + $0x30] sm:$0xff] }
  0x2c   :  { %386 = vmatpush3.bf16.msra.mxu1 %v385_v15  ;;  %v59_v23 = vld [vmem:[#allocation2 + $0x48] sm:$0xff]  ;;  %v391_v24 = vpack.c.bf16 %v149_v20, %v148_v19  ;;  %v151_v26 = vld [vmem:[#allocation5 + $0x38] sm:$0xff]  ;;  %v60_v28 = vld [vmem:[#allocation2 + $0x50] sm:$0xff] }
  0x2d   :  { %387 = vmatprep.subr.bf16.mxu1 %v492_v0  ;;  %v373_v27 = vpack.c.bf16 %v59_v23, %v58_v22  ;;  %v61_v29 = vld [vmem:[#allocation2 + $0x58] sm:$0xff]  ;;  %v394_v30 = vpack.c.bf16 %v151_v26, %v150_v25  ;;  %v152_v31 = vld [vmem:[#allocation5 + $0x40] sm:$0xff]  ;;  %v153_v32 = vld [vmem:[#allocation5 + $0x48] sm:$0xff] }
  0x2e   :  { %365 = vmatpush3.bf16.msra.mxu0 %v364_v7  ;;  %v376_v33 = vpack.c.bf16 %v61_v29, %v60_v28  ;;  %v62_v34 = vld [vmem:[#allocation2 + $0x60] sm:$0xff]  ;;  %v63_v35 = vld [vmem:[#allocation2 + $0x68] sm:$0xff]  ;;  %v397_v36 = vpack.c.bf16 %v153_v32, %v152_v31  ;;  %v154_v37 = vld [vmem:[#allocation5 + $0x50] sm:$0xff] }
  0x2f   :  { %366 = vmatprep.subr.bf16.mxu0 %v492_v0  ;;  %v155_v38 = vld [vmem:[#allocation5 + $0x58] sm:$0xff]  ;;  %v379_v39 = vpack.c.bf16 %v63_v35, %v62_v34  ;;  %v64_v40 = vld [vmem:[#allocation2 + $0x70] sm:$0xff]  ;;  %v156_v43 = vld [vmem:[#allocation5 + $0x60] sm:$0xff] }
  0x30   :  { %389 = vmatpush3.bf16.msra.mxu1 %v388_v18  ;;  %v65_v41 = vld [vmem:[#allocation2 + $0x78] sm:$0xff]  ;;  %v400_v42 = vpack.c.bf16 %v155_v38, %v154_v37  ;;  %v157_v44 = vld [vmem:[#allocation5 + $0x68] sm:$0xff]  ;;  %v158_v48 = vld [vmem:[#allocation5 + $0x70] sm:$0xff] }
  0x31   :  { %390 = vmatprep.subr.bf16.mxu1 %v492_v0  ;;  %v382_v45 = vpack.c.bf16 %v65_v41, %v64_v40  ;;  %v403_v46 = vpack.c.bf16 %v157_v44, %v156_v43  ;;  %v49_v47 = vld [vmem:[%s587_s0] sm:$0xff]  ;;  %s495_s0 = smov [#allocation7]  }
  0x32   :  { %368 = vmatpush3.bf16.msra.mxu0 %v367_v14  ;;  %v159_v49 = vld [vmem:[#allocation5 + $0x78] sm:$0xff]  ;;  %s244_s23 = sshll.u32 %s495_s0, 4  ;;  %s245_s23 = int_to_ptr.vmem [resolvable:$true] %s244_s23 }
  0x33   :  { %369 = vmatprep.subr.bf16.mxu0 %v492_v0  ;;  %v406_v50 = vpack.c.bf16 %v159_v49, %v158_v48  ;;  %v254_v51 = vld [vmem:[%s589_s2] ss:$0 sm:$0xff]  ;;  %s460_s24 = scalar_lea.vmem %s245_s23, 128  ;;  %p465_p3 = scmp.lt.s32.totalorder %s245_s23, %s245_s23 }
  0x34   :  { %392 = vmatpush3.bf16.msra.mxu1 %v391_v24  ;;  %v255_v56 = vld [vmem:[%s591_s4] ss:$0 sm:$0xff]  ;;  %p461_p2 = scmp.ne.s32.totalorder %s245_s23, %s460_s24  ;;  %p466_p4 = scmp.lt.s32.totalorder %s460_s24, %s460_s24 }
  0x35   :  { %393 = vmatprep.subr.bf16.mxu1 %v492_v0 }
  0x36   :  { %371 = vmatpush3.bf16.msra.mxu0 %v370_v21  ;;  %p467_p5 = por %p466_p4, %p465_p3 }
  0x37   :  { %372 = vmatprep.subr.bf16.mxu0 %v492_v0 }
  0x38   :  { %395 = vmatpush3.bf16.msra.mxu1 %v394_v30  ;;  %p468_p6 = pnand %p467_p5, %p461_p2 }
  0x39   :  { %396 = vmatprep.subr.bf16.mxu1 %v492_v0 }
  0x3a   :  { %374 = vmatpush3.bf16.msra.mxu0 %v373_v27 }
  0x3b   :  { %375 = vmatprep.subr.bf16.mxu0 %v492_v0 }
  0x3c   :  { %398 = vmatpush3.bf16.msra.mxu1 %v397_v36 }
  0x3d   :  { %399 = vmatprep.subr.bf16.mxu1 %v492_v0 }
  0x3e   :  { %377 = vmatpush3.bf16.msra.mxu0 %v376_v33 }
  0x3f   :  { %378 = vmatprep.subr.bf16.mxu0 %v492_v0 }
  0x40   :  { %401 = vmatpush3.bf16.msra.mxu1 %v400_v42 }
  0x41   :  { %402 = vmatprep.subr.bf16.mxu1 %v492_v0 }
  0x42   :  { %380 = vmatpush3.bf16.msra.mxu0 %v379_v39 }
  0x43   :  { %381 = vmatprep.subr.bf16.mxu0 %v492_v0 }
  0x44   :  { %404 = vmatpush3.bf16.msra.mxu1 %v403_v46 }
  0x45   :  { %405 = vmatprep.subr.bf16.mxu1 %v492_v0 }
  0x46   :  { %383 = vmatpush3.bf16.msra.mxu0 %v382_v45 }
  0x48   :  { %407 = vmatpush3.bf16.msra.mxu1 %v406_v50 }
  0x49   :  { %323 = vmatmul.mubr.f32.vlgmr.msra.gmra.mrb[0].mxu0 %v49_v47 }
 0x11c   :  { %v139_v52 = vpop.f32.mrb[0].mxu0 }
 0x11d   :  { %v140_v53 = vadd.f32 %v254_v51, %v139_v52  ;;  %v324_v54 = vpop.f32.mrb[1].mxu0 }
 0x11f   :  { %v143_v55 = vmax.f32 %v140_v53, 0.0 }
 0x121   :  { %358 = vmatmul.mubr.f32.vlgmr.msra.gmra.mrb[0].mxu1 %v143_v55 }
 0x1f4   :  { %v233_v57 = vpop.f32.mrb[0].mxu1 }
 0x1f5   :  { %v234_v58 = vadd.f32 %v255_v56, %v233_v57  ;;  %v359_v59 = vpop.f32.mrb[1].mxu1 }
 0x1f7   :  { %237 = vst [vmem:[#allocation7] sm:$0xff] %v234_v58 }
 0x1f8   :  { %471 = shalt.err (!%p468_p6)
}
 0x1f9   :  { %s472_s26 = scalar_lea.hbm %s592_s5, 128 }
 0x1fa   :  { %p473_p7 = scmp.ne.s32.totalorder %s592_s5, %s472_s26  ;;  %p476_p8 = scmp.lt.u32.totalorder %s472_s26, %s592_s5 }
 0x1fc   :  { %p478_p9 = pnand %p476_p8, %p473_p7 }
 0x1fe   :  { %481 = shalt.err (!%p478_p9)
}
 0x1ff   :  { %247 = dma.vmem_to_hbm [thread:$0]  %s245_s23, 128, %s592_s5, [#allocation4]  }
 0x200   :  { %486 = dma.done.wait [#allocation4], 128  }
 0x201   :  { %487 = vsyncadd [#allocation4], 4294967168 }
 0x202   :  { %251 = vsyncpa [#allocation3], 1 }
 0x203   :  { %252 = vsyncpa [#allocation6], 1 }
 0x204   :  { %253 = vsyncpa [#allocation4], 1 }

</bundles_post_ra>
